<compile_context>
chip_gen: v5e
topology: v5e:2x2
jax: 0.10.0
libtpu: 0.0.40
codegen_flags: <defaults>
</compile_context>

<pallas_src>
import jax
import jax.numpy as jnp
from jax.experimental import pallas as pl
from jax.experimental.pallas import tpu as pltpu

LANE = 128
MAX_BLOCK_ROWS = 2048     # (2048, 128) f32 = 1 MiB per input block
NUM_SPLITS = 2            # leading "parallel" axis for v7x megacore; harmless on 1-TC chips
_PAD_LOGIT = -1e4         # tanh(0.5 * -1e4) == -1 exactly -> sigmoid == 0 for padded lanes


def _ceil_to(a, b):
    return -(-a // b) * b


def _sublane_multiple(dtype):
    itemsize = jnp.dtype(dtype).itemsize
    if itemsize >= 4:
        return 8
    if itemsize == 2:
        return 16
    return 32


def dice_loss(inputs, targets, smooth=1.0):
    """Pallas implementation of DiceLoss.forward (returns a scalar)."""
    x = inputs.reshape(-1)
    t = targets.reshape(-1)
    n = x.shape[0]

    # Dtype-aware sublane granularity for the (rows, 128) layout.
    sublane = max(_sublane_multiple(x.dtype), _sublane_multiple(t.dtype))
    rows = _ceil_to(pl.cdiv(n, LANE), sublane)
    block_rows = min(MAX_BLOCK_ROWS, rows)        # MAX_BLOCK_ROWS is a multiple of 32
    n_pad = rows * LANE

    if n_pad != n:
        # Sub-block tail pad only (< sublane*128 elements) so the reshape to
        # (rows, 128) is exact.  Padded logits -> sigmoid == 0, padded
        # targets == 0, so no mask array is streamed for these lanes.
        x = jnp.pad(x, (0, n_pad - n), constant_values=_PAD_LOGIT)
        t = jnp.pad(t, (0, n_pad - n), constant_values=0)

    x = x.reshape(rows, LANE)
    t = t.reshape(rows, LANE)

    n_blocks = pl.cdiv(rows, block_rows)
    num_splits = min(NUM_SPLITS, n_blocks)
    inner = pl.cdiv(n_blocks, num_splits)
    # Phantom blocks (odd n_blocks split across cores) are clamped to the last
    # real block and fully masked; a partial tail block is masked by row index.
    need_clamp = num_splits * inner != n_blocks
    needs_mask = num_splits * inner * block_rows != rows

    if need_clamp:
        in_map = lambda c, i: (jnp.minimum(c * inner + i, n_blocks - 1), 0)
    else:
        in_map = lambda c, i: (c * inner + i, 0)

    def kernel(x_ref, t_ref, out_ref):
        c = pl.program_id(0)
        i = pl.program_id(1)

        @pl.when(i == 0)
        def _():
            out_ref[...] = jnp.zeros_like(out_ref)

        xv = x_ref[...].astype(jnp.float32)
        tv = t_ref[...].astype(jnp.float32)
        # Single-EUP-push sigmoid: sigmoid(x) = 0.5 * (1 + tanh(x / 2)).
        s = 0.5 * (1.0 + jnp.tanh(0.5 * xv))

        if needs_mask:
            # Global-row mask: zeroes out-of-range rows of the partial tail
            # block and entire phantom blocks (cheap VPU compare+select,
            # hidden under the input DMA; emitted only when required).
            gstart = (c * inner + i) * block_rows
            rid = jax.lax.broadcasted_iota(jnp.int32, (block_rows, LANE), 0) + gstart
            valid = rid < rows
            s = jnp.where(valid, s, 0.0)
            tv = jnp.where(valid, tv, 0.0)

        # Per-block sublane reduction into tiny (8,128) accumulators that live
        # in the output block (block index constant across the "arbitrary"
        # axis): 2 accumulators (intersection, s + t), no full-block RMW.
        inter = jnp.sum((s * tv).reshape(block_rows // 8, 8, LANE), axis=0)
        denom = jnp.sum((s + tv).reshape(block_rows // 8, 8, LANE), axis=0)
        out_ref[0, 0] += inter
        out_ref[0, 1] += denom

    blk = pl.BlockSpec((block_rows, LANE), in_map)
    n_total = rows * LANE
    cost = pl.CostEstimate(
        flops=7 * n_total,
        transcendentals=n_total,
        bytes_accessed=(x.size * x.dtype.itemsize
                        + t.size * t.dtype.itemsize
                        + num_splits * 2 * 8 * LANE * 4),
    )

    partial = pl.pallas_call(
        kernel,
        out_shape=jax.ShapeDtypeStruct((num_splits, 2, 8, LANE), jnp.float32),
        grid_spec=pltpu.PrefetchScalarGridSpec(
            num_scalar_prefetch=0,
            grid=(num_splits, inner),
            in_specs=[blk, blk],
            out_specs=pl.BlockSpec((1, 2, 8, LANE), lambda c, i: (c, 0, 0, 0)),
        ),
        compiler_params=pltpu.CompilerParams(
            dimension_semantics=("parallel", "arbitrary")),
        cost_estimate=cost,
    )(x, t)

    # Tiny epilogue reduce (num_splits * 2 * 8 * 128 f32) in plain JAX.
    intersection = jnp.sum(partial[:, 0])
    denom_sum = jnp.sum(partial[:, 1])
    dice = (2.0 * intersection + smooth) / (denom_sum + smooth)
    return 1.0 - dice


def dice_loss_ref(inputs, targets, smooth=1.0):
    """Pure-JAX reference matching the PyTorch module."""
    x = jax.nn.sigmoid(inputs.astype(jnp.float32)).reshape(-1)
    t = targets.astype(jnp.float32).reshape(-1)
    inter = jnp.sum(x * t)
    dice = (2.0 * inter + smooth) / (jnp.sum(x) + jnp.sum(t) + smooth)
    return 1.0 - dice


if __name__ == "__main__":
    key = jax.random.PRNGKey(0)
    k1, k2 = jax.random.split(key)

    # NCHW, consistent with the PyTorch module's usage (segmentation logits).
    B, C, H, W = 2, 4, 16, 16
    inputs = jax.random.normal(k1, (B, C, H, W), dtype=jnp.float32)
    targets = (jax.random.uniform(k2, (B, C, H, W)) > 0.5).astype(jnp.float32)

    loss = dice_loss(inputs, targets, smooth=1.0)
    jax.block_until_ready(loss)

    ref = dice_loss_ref(inputs, targets, smooth=1.0)
    assert jnp.allclose(loss, ref, atol=1e-5, rtol=1e-5), (loss, ref)

    print("KERNEL_OK")
</pallas_src>

<mosaic_0001>
module attributes {stable_mosaic.version = 11 : i64} {
  func.func @kernel(%arg0: i32, %arg1: i32, %arg2: memref<16x128xf32, #tpu.memory_space<vmem>>, %arg3: memref<16x128xf32, #tpu.memory_space<vmem>>, %arg4: memref<1x2x8x128xf32, #tpu.memory_space<vmem>>) attributes {dimension_semantics = [#tpu.dimension_semantics<parallel>, #tpu.dimension_semantics<arbitrary>], iteration_bounds = array<i64: 1, 1>, scalar_prefetch = 0 : i64, scratch_operands = 0 : i64, tpu.core_type = #tpu.core_type<tc>, window_params = [{transform_indices = @transform_0, window_bounds = array<i64: 16, 128>}, {transform_indices = @transform_1, window_bounds = array<i64: 16, 128>}, {transform_indices = @transform_2, window_bounds = array<i64: 1, 2, 8, 128>}]} {
    %c0_i32 = arith.constant 0 : i32
    %0 = arith.cmpi eq, %arg1, %c0_i32 : i32
    %1 = arith.extui %0 : i1 to i32
    %c0_i32_0 = arith.constant 0 : i32
    %2 = arith.cmpi ne, %1, %c0_i32_0 : i32
    scf.if %2 {
      %cst_23 = arith.constant 0.000000e+00 : f32
      %30 = vector.broadcast %cst_23 : f32 to vector<1x2x8x128xf32>
      %c0_24 = arith.constant 0 : index
      %c0_25 = arith.constant 0 : index
      %c0_26 = arith.constant 0 : index
      %c0_27 = arith.constant 0 : index
      %31 = vector.load %arg4[%c0_24, %c0_25, %c0_26, %c0_27] : memref<1x2x8x128xf32, #tpu.memory_space<vmem>>, vector<1x2x8x128xf32>
      tpu.vector_store %arg4[%c0_24, %c0_25, %c0_26, %c0_27], %30 {strides = array<i32>} : memref<1x2x8x128xf32, #tpu.memory_space<vmem>>, vector<1x2x8x128xf32>,
    } else {
    }
    %c0 = arith.constant 0 : index
    %c0_1 = arith.constant 0 : index
    %3 = vector.load %arg2[%c0, %c0_1] : memref<16x128xf32, #tpu.memory_space<vmem>>, vector<16x128xf32>
    %c0_2 = arith.constant 0 : index
    %c0_3 = arith.constant 0 : index
    %4 = vector.load %arg3[%c0_2, %c0_3] : memref<16x128xf32, #tpu.memory_space<vmem>>, vector<16x128xf32>
    %cst = arith.constant 5.000000e-01 : f32
    %5 = vector.broadcast %cst : f32 to vector<16x128xf32>
    %6 = arith.mulf %5, %3 : vector<16x128xf32>
    %7 = math.tanh %6 : vector<16x128xf32>
    %cst_4 = arith.constant 1.000000e+00 : f32
    %8 = vector.broadcast %cst_4 : f32 to vector<16x128xf32>
    %9 = arith.addf %8, %7 : vector<16x128xf32>
    %cst_5 = arith.constant 5.000000e-01 : f32
    %10 = vector.broadcast %cst_5 : f32 to vector<16x128xf32>
    %11 = arith.mulf %10, %9 : vector<16x128xf32>
    %12 = arith.mulf %11, %4 : vector<16x128xf32>
    %13 = vector.shape_cast %12 : vector<16x128xf32> to vector<2x8x128xf32>
    %cst_6 = arith.constant dense<0.000000e+00> : vector<8x128xf32>
    %14 = vector.multi_reduction <add>, %13, %cst_6 [0] : vector<2x8x128xf32> to vector<8x128xf32>
    %15 = arith.addf %11, %4 : vector<16x128xf32>
    %16 = vector.shape_cast %15 : vector<16x128xf32> to vector<2x8x128xf32>
    %cst_7 = arith.constant dense<0.000000e+00> : vector<8x128xf32>
    %17 = vector.multi_reduction <add>, %16, %cst_7 [0] : vector<2x8x128xf32> to vector<8x128xf32>
    %c0_8 = arith.constant 0 : index
    %c0_9 = arith.constant 0 : index
    %c0_10 = arith.constant 0 : index
    %c0_11 = arith.constant 0 : index
    %18 = vector.load %arg4[%c0_8, %c0_9, %c0_10, %c0_11] : memref<1x2x8x128xf32, #tpu.memory_space<vmem>>, vector<1x1x8x128xf32>
    %19 = vector.shape_cast %18 : vector<1x1x8x128xf32> to vector<8x128xf32>
    %20 = arith.addf %19, %14 : vector<8x128xf32>
    %c0_12 = arith.constant 0 : index
    %c0_13 = arith.constant 0 : index
    %c0_14 = arith.constant 0 : index
    %c0_15 = arith.constant 0 : index
    %21 = vector.load %arg4[%c0_12, %c0_13, %c0_14, %c0_15] : memref<1x2x8x128xf32, #tpu.memory_space<vmem>>, vector<1x1x8x128xf32>
    %22 = vector.shape_cast %21 : vector<1x1x8x128xf32> to vector<8x128xf32>
    %23 = vector.shape_cast %20 : vector<8x128xf32> to vector<1x1x8x128xf32>
    tpu.vector_store %arg4[%c0_12, %c0_13, %c0_14, %c0_15], %23 {strides = array<i32>} : memref<1x2x8x128xf32, #tpu.memory_space<vmem>>, vector<1x1x8x128xf32>,
    %c0_16 = arith.constant 0 : index
    %c1 = arith.constant 1 : index
    %c0_17 = arith.constant 0 : index
    %c0_18 = arith.constant 0 : index
    %24 = vector.load %arg4[%c0_16, %c1, %c0_17, %c0_18] : memref<1x2x8x128xf32, #tpu.memory_space<vmem>>, vector<1x1x8x128xf32>
    %25 = vector.shape_cast %24 : vector<1x1x8x128xf32> to vector<8x128xf32>
    %26 = arith.addf %25, %17 : vector<8x128xf32>
    %c0_19 = arith.constant 0 : index
    %c1_20 = arith.constant 1 : index
    %c0_21 = arith.constant 0 : index
    %c0_22 = arith.constant 0 : index
    %27 = vector.load %arg4[%c0_19, %c1_20, %c0_21, %c0_22] : memref<1x2x8x128xf32, #tpu.memory_space<vmem>>, vector<1x1x8x128xf32>
    %28 = vector.shape_cast %27 : vector<1x1x8x128xf32> to vector<8x128xf32>
    %29 = vector.shape_cast %26 : vector<8x128xf32> to vector<1x1x8x128xf32>
    tpu.vector_store %arg4[%c0_19, %c1_20, %c0_21, %c0_22], %29 {strides = array<i32>} : memref<1x2x8x128xf32, #tpu.memory_space<vmem>>, vector<1x1x8x128xf32>,
    return
  }
  func.func @transform_0(%arg0: i32, %arg1: i32) -> (i32, i32) {
    %c1_i32 = arith.constant 1 : i32
    %0 = arith.muli %arg0, %c1_i32 : i32
    %1 = arith.addi %0, %arg1 : i32
    %c0_i32 = arith.constant 0 : i32
    %c0_i32_0 = arith.constant 0 : i32
    return %1, %c0_i32 : i32, i32
  }
  func.func @transform_1(%arg0: i32, %arg1: i32) -> (i32, i32) {
    %c1_i32 = arith.constant 1 : i32
    %0 = arith.muli %arg0, %c1_i32 : i32
    %1 = arith.addi %0, %arg1 : i32
    %c0_i32 = arith.constant 0 : i32
    %c0_i32_0 = arith.constant 0 : i32
    return %1, %c0_i32 : i32, i32
  }
  func.func @transform_2(%arg0: i32, %arg1: i32) -> (i32, i32, i32, i32) {
    %c0_i32 = arith.constant 0 : i32
    %c0_i32_0 = arith.constant 0 : i32
    %c0_i32_1 = arith.constant 0 : i32
    %c0_i32_2 = arith.constant 0 : i32
    return %arg0, %c0_i32, %c0_i32_0, %c0_i32_1 : i32, i32, i32, i32
  }
}

</mosaic_0001>

<bundles_post_ra>
// kernel: tpu_custom_call.1
= control target key start
LH: loop header
LB: loop body
LE: loop exit
PB: predicated region body
PF: predicated region fallthrough
CT: control target
= control target key end

     0   :  { %7 = vsyncpa [#allocation3], 0  ;;  %s233_s0 = inlined_call_operand.hbm [shape: f32[16,128], index: 0, kind: input, shape index: {}]   ;;  %s234_s1 = inlined_call_operand.hbm [shape: f32[16,128], index: 1, kind: input, shape index: {}]   ;;  %s235_s2 = inlined_call_operand.hbm [shape: f32[1,2,8,128], index: 2, kind: output, shape index: {}]  }
   0x1   :  { %8 = vsyncpa [#allocation6], 0 }
   0x2   :  { %9 = vsyncpa [#allocation4], 0  ;;  %s18_s11 = sshll.u32 %s233_s0, 4  ;;  %s195_s12 = smov [#allocation2]   ;;  %s19_s11 = int_to_ptr.hbm [resolvable:$true] %s18_s11 }
   0x3   :  { %s20_s13 = sshll.u32 %s195_s12, 4  ;;  %s35_s16 = sshll.u32 %s234_s1, 4  ;;  %s21_s13 = int_to_ptr.vmem [resolvable:$true] %s20_s13  ;;  %s36_s16 = int_to_ptr.hbm [resolvable:$true] %s35_s16 }
   0x4   :  { %s196_s17 = smov 128   ;;  %s197_s18 = smov 8  }
   0x5   :  { %26 = dma.hbm_to_vmem [thread:$0]  %s19_s11, 256, %s21_s13, [#allocation3], %s196_s17, %s196_s17, %s197_s18  }
   0x6   :  { %s198_s19 = smov [#allocation5]  }
   0x7   :  { %s37_s20 = sshll.u32 %s198_s19, 4  ;;  %s38_s20 = int_to_ptr.vmem [resolvable:$true] %s37_s20 }
   0x8   :  { %43 = dma.hbm_to_vmem [thread:$0]  %s36_s16, 256, %s38_s20, [#allocation6], %s196_s17, %s196_s17, %s197_s18  }
   0x9   :  { %189 = dma.done.wait [#allocation3], 256  }
   0xa   :  { %190 = vsyncadd [#allocation3], 4294967040 }
   0xb   :  { %191 = dma.done.wait [#allocation6], 256  }
   0xc   :  { %192 = vsyncadd [#allocation6], 4294967040  ;;  %v62_v0 = vld [vmem:[#allocation2] sm:$0xff]  ;;  %v63_v1 = vld [vmem:[#allocation2 + $0x8] sm:$0xff]  ;;  %s199_s0 = smov [#allocation7]   ;;  %s93_s23 = sshll.u32 %s235_s2, 4  ;;  %s94_s23 = int_to_ptr.hbm [resolvable:$true] %s93_s23 }
   0xd   :  { %v66_v2 = vmul.f32 0.5, %v62_v0  ;;  %v67_v3 = vmul.f32 0.5, %v63_v1  ;;  %v64_v7 = vld [vmem:[#allocation5] sm:$0xff]  ;;  %v65_v9 = vld [vmem:[#allocation5 + $0x8] sm:$0xff]  ;;  %s91_s1 = sshll.u32 %s199_s0, 4  ;;  %s92_s1 = int_to_ptr.vmem [resolvable:$true] %s91_s1 }
   0xf   :  { %113 = vtanh.f32 %v66_v2 }
  0x10   :  { %115 = vtanh.f32 %v67_v3 }
  0x15   :  { %v114_v4 = vpop.eup %113 }
  0x16   :  { %v116_v5 = vpop.eup %115  ;;  %v70_v6 = vadd.f32 1.0, %v114_v4 }
  0x17   :  { %v71_v8 = vadd.f32 1.0, %v116_v5 }
  0x18   :  { %v72_v10 = vmul.f32 0.5, %v70_v6 }
  0x19   :  { %v73_v11 = vmul.f32 0.5, %v71_v8 }
  0x1a   :  { %v74_v12 = vmul.f32 %v72_v10, %v64_v7  ;;  %v77_v13 = vadd.f32 %v72_v10, %v64_v7 }
  0x1b   :  { %v75_v14 = vmul.f32 %v73_v11, %v65_v9  ;;  %v78_v15 = vadd.f32 %v73_v11, %v65_v9 }
  0x1d   :  { %v76_v16 = vadd.f32 %v75_v14, %v74_v12  ;;  %v79_v17 = vadd.f32 %v78_v15, %v77_v13 }
  0x1f   :  { %82 = vst [vmem:[#allocation7] sm:$0xff] %v76_v16 }
  0x20   :  { %86 = vst [vmem:[#allocation7 + $0x8] sm:$0xff] %v79_v17 }
  0x21   :  { %99 = dma.vmem_to_hbm [thread:$0]  %s92_s1, 256, %s94_s23, [#allocation4], %s196_s17, %s196_s17, %s197_s18  }
  0x22   :  { %193 = dma.done.wait [#allocation4], 256  }
  0x23   :  { %194 = vsyncadd [#allocation4], 4294967040 }
  0x24   :  { %104 = vsyncpa [#allocation3], 1 }
  0x25   :  { %105 = vsyncpa [#allocation6], 1 }
  0x26   :  { %106 = vsyncpa [#allocation4], 1 }

</bundles_post_ra>
